<compile_context>
chip_gen: v6e
topology: v6e:2x2x1
jax: 0.10.0
libtpu: 0.0.40
codegen_flags: <defaults>
</compile_context>

<pallas_src>
import functools

import jax
import jax.numpy as jnp
from jax.experimental import pallas as pl
from jax.experimental.pallas import tpu as pltpu

_SQRT_HALF = 0.7071067811865476


def _round_up(x, m):
    return (x + m - 1) // m * m


def _gelu(h, approximate):
    if approximate:
        # tanh approximation rides the EUP slot instead of a VALU erf polynomial.
        return jax.nn.gelu(h, approximate=True)
    return 0.5 * h * (1.0 + jax.lax.erf(h * jnp.float32(_SQRT_HALF)))


# ---------------------------------------------------------------------------
# Kernels
# ---------------------------------------------------------------------------

def ffn_kernel_resident(x_ref, w1_ref, b1_ref, w2_ref, b2_ref, o_ref, *,
                        approximate):
    """Full FFN width resident in VMEM; grid iterates M row tiles only."""
    h = jnp.dot(x_ref[...], w1_ref[...], preferred_element_type=jnp.float32)
    h = h + b1_ref[...].astype(jnp.float32)
    g = _gelu(h, approximate)
    y = jnp.dot(g.astype(w2_ref.dtype), w2_ref[...],
                preferred_element_type=jnp.float32)
    o_ref[...] = (y + b2_ref[...].astype(jnp.float32)).astype(o_ref.dtype)


def ffn_kernel_streamed(x_ref, w1_ref, b1_ref, w2_ref, b2_ref, o_ref, acc_ref,
                        *, approximate):
    """FFN width streamed in tiles; second matmul partial-sums into f32 acc."""
    f = pl.program_id(1)

    @pl.when(f == 0)
    def _():
        # Start the accumulator at the broadcast output bias (saves the
        # epilogue (tm, H) add).
        acc_ref[...] = jnp.broadcast_to(
            b2_ref[...].astype(jnp.float32), acc_ref.shape)

    # layer1 on this F tile: [tm, H] @ [H, tf] -> f32 [tm, tf]
    h = jnp.dot(x_ref[...], w1_ref[...], preferred_element_type=jnp.float32)
    h = h + b1_ref[...].astype(jnp.float32)
    g = _gelu(h, approximate)

    # layer2 partial sum: [tm, tf] @ [tf, H] -> f32 accumulator
    acc_ref[...] += jnp.dot(g.astype(w2_ref.dtype), w2_ref[...],
                            preferred_element_type=jnp.float32)

    @pl.when(f == pl.num_programs(1) - 1)
    def _():
        o_ref[...] = acc_ref[...].astype(o_ref.dtype)


# ---------------------------------------------------------------------------
# Tile / VMEM planning
# ---------------------------------------------------------------------------

def _vmem_budget_bytes():
    """Per-core VMEM budget with headroom. Conservative fallback = v7x 64 MiB."""
    cap = 64 << 20
    try:
        info = pltpu.get_tpu_info()
        got = getattr(info, "vmem_capacity_bytes", None)
        if got:
            cap = int(got)
    except Exception:
        pass
    return (cap * 3) // 4


def _resident_bytes(tm, H, F, xb, wb, ob):
    return (2 * tm * H * (xb + ob)        # x / out row tiles (double-buffered)
            + 2 * 2 * H * F * wb          # W1 + W2 (pipeline buffers)
            + 2 * (F + H) * 4             # biases
            + 2 * tm * F * 4)             # h / gelu f32 intermediates


def _streamed_bytes(tm, tf, H, xb, wb, ob):
    return (2 * tm * H * (xb + ob)        # x / out row tiles
            + 2 * 2 * H * tf * wb         # W1 column tile + W2 row tile
            + 2 * (tf + H) * 4            # biases
            + tm * H * 4                  # f32 accumulator scratch
            + 2 * tm * tf * 4)            # h / gelu f32 intermediates


def _pick_tiles(M, H, F, xb, wb, ob, budget, tile_m, tile_f,
                allow_resident=True):
    """Returns (tm, tf, resident, pad_f)."""
    Mr = _round_up(max(M, 1), 16)
    base = (1024, 512, 256, 128, 64, 32, 16)
    tms, seen = [], set()
    for t in base:
        if t > max(tile_m, 16):
            continue
        t = min(t, Mr)
        if t not in seen:
            seen.add(t)
            tms.append(t)
    if not tms:
        tms = [min(16, Mr)]

    # 1) Weight-resident fast path: both weight matrices live in VMEM, read
    #    from HBM exactly once.
    if allow_resident:
        for tm in tms:
            if _resident_bytes(tm, H, F, xb, wb, ob) <= budget:
                return tm, F, True, False

    # 2) Streamed path: tf is a divisor of F that is a multiple of 128, so no
    #    per-call weight padding / re-materialisation.
    tf0, pad_f = None, False
    if F <= tile_f:
        tf0 = F
    else:
        for cand in range(tile_f - tile_f % 128, 127, -128):
            if F % cand == 0:
                tf0 = cand
                break
    if tf0 is None:                       # no clean divisor -> pad (fallback)
        tf0, pad_f = min(tile_f, _round_up(F, 128)), True

    tf = tf0
    while True:
        for tm in tms:
            if _streamed_bytes(tm, tf, H, xb, wb, ob) <= budget:
                return tm, tf, False, pad_f
        if tf >= 256 and tf % 256 == 0:
            tf //= 2
        else:
            break
    return tms[-1], tf, False, pad_f      # best effort for extreme shapes


# ---------------------------------------------------------------------------
# Wrapper
# ---------------------------------------------------------------------------

def ffn_pallas(x2d, w1, b1, w2, b2, *, tile_m=512, tile_f=1024,
               approximate_gelu=False, _force_streamed=False):
    M, H = x2d.shape
    F = w1.shape[1]
    out_dtype = x2d.dtype

    xb = jnp.dtype(x2d.dtype).itemsize
    wb = jnp.dtype(w1.dtype).itemsize
    ob = jnp.dtype(out_dtype).itemsize

    budget = _vmem_budget_bytes()
    tile_f = _round_up(max(tile_f, 128), 128)
    tm, tf, resident, pad_f = _pick_tiles(
        M, H, F, xb, wb, ob, budget, tile_m, tile_f,
        allow_resident=not _force_streamed)

    # Ensure >= 2 row tiles when M allows so the "parallel" M axis can be
    # sharded across TensorCores (v7x megacore).
    if tm > 128 and _round_up(M, tm) // tm < 2:
        tm = max(128, _round_up((M + 1) // 2, 16))

    Mp = _round_up(M, tm)
    if Mp != M:
        x2d = jnp.pad(x2d, ((0, Mp - M), (0, 0)))

    Fp = F
    if (not resident) and pad_f:
        Fp = _round_up(F, tf)
        if Fp != F:
            # zero-padded FFN columns contribute gelu(0) @ 0 == 0
            w1 = jnp.pad(w1, ((0, 0), (0, Fp - F)))
            b1 = jnp.pad(b1, ((0, 0), (0, Fp - F)))
            w2 = jnp.pad(w2, ((0, Fp - F), (0, 0)))

    n_row = Mp // tm
    need = (_resident_bytes(tm, H, Fp, xb, wb, ob) if resident
            else _streamed_bytes(tm, tf, H, xb, wb, ob))
    vmem_limit = int(min(budget, max(32 << 20, need * 3 // 2)))
    vmem_limit = int(max(vmem_limit, need))   # never below actual footprint

    # bytes_accessed reflects the real schedule: resident reads weights once,
    # streamed re-reads W1/W2 once per M row tile.
    weight_reads = 1 if resident else n_row
    cost = pl.CostEstimate(
        flops=4 * Mp * H * Fp,
        transcendentals=Mp * Fp,
        bytes_accessed=(Mp * H * xb + weight_reads * 2 * H * Fp * wb
                        + (Fp + H) * 4 + Mp * H * ob),
    )

    if resident:
        kern = functools.partial(ffn_kernel_resident,
                                 approximate=approximate_gelu)
        grid_spec = pltpu.PrefetchScalarGridSpec(
            num_scalar_prefetch=0,
            grid=(n_row,),
            in_specs=[
                pl.BlockSpec((tm, H), lambda i: (i, 0)),   # x row tile
                pl.BlockSpec((H, Fp), lambda i: (0, 0)),   # W1 (VMEM-resident)
                pl.BlockSpec((1, Fp), lambda i: (0, 0)),   # b1
                pl.BlockSpec((Fp, H), lambda i: (0, 0)),   # W2 (VMEM-resident)
                pl.BlockSpec((1, H), lambda i: (0, 0)),    # b2
            ],
            out_specs=pl.BlockSpec((tm, H), lambda i: (i, 0)),
        )
        dims = ("parallel",)
    else:
        kern = functools.partial(ffn_kernel_streamed,
                                 approximate=approximate_gelu)
        grid_spec = pltpu.PrefetchScalarGridSpec(
            num_scalar_prefetch=0,
            grid=(n_row, Fp // tf),
            in_specs=[
                pl.BlockSpec((tm, H), lambda i, f: (i, 0)),   # x row tile
                pl.BlockSpec((H, tf), lambda i, f: (0, f)),   # W1 column tile
                pl.BlockSpec((1, tf), lambda i, f: (0, f)),   # b1 tile
                pl.BlockSpec((tf, H), lambda i, f: (f, 0)),   # W2 row tile
                pl.BlockSpec((1, H), lambda i, f: (0, 0)),    # b2
            ],
            out_specs=pl.BlockSpec((tm, H), lambda i, f: (i, 0)),
            scratch_shapes=[pltpu.VMEM((tm, H), jnp.float32)],
        )
        dims = ("parallel", "arbitrary")

    out = pl.pallas_call(
        kern,
        out_shape=jax.ShapeDtypeStruct((Mp, H), out_dtype),
        grid_spec=grid_spec,
        compiler_params=pltpu.CompilerParams(
            dimension_semantics=dims,
            vmem_limit_bytes=vmem_limit,
        ),
        cost_estimate=cost,
    )(x2d, w1, b1, w2, b2)
    return out[:M]


def feed_forward_network(x, w1, b1, w2, b2, *, tile_m=512, tile_f=1024,
                         approximate_gelu=False, _force_streamed=False):
    # x: [..., hidden] -> same shape out. Biases may be 1-D (torch) or [1, n].
    # NOTE: for max MXU throughput on v6e/v7x, pass bf16 x/W (f32 accumulation
    # and f32 GELU are kept inside the kernel regardless).
    lead = x.shape[:-1]
    H = x.shape[-1]
    x2d = x.reshape(-1, H)
    b1 = jnp.reshape(b1, (1, -1))
    b2 = jnp.reshape(b2, (1, -1))
    y2d = ffn_pallas(x2d, w1, b1, w2, b2, tile_m=tile_m, tile_f=tile_f,
                     approximate_gelu=approximate_gelu,
                     _force_streamed=_force_streamed)
    return y2d.reshape(*lead, H)


def _ref_ffn(x, w1, b1, w2, b2):
    # pure-JAX reference (exact erf GELU == torch.nn.GELU() default)
    lead = x.shape[:-1]
    H = x.shape[-1]
    h = x.reshape(-1, H) @ w1 + jnp.reshape(b1, (1, -1))
    g = 0.5 * h * (1.0 + jax.lax.erf(h / jnp.sqrt(2.0)))
    return (g @ w2 + jnp.reshape(b2, (1, -1))).reshape(*lead, H)


if __name__ == "__main__":
    key = jax.random.PRNGKey(0)

    # ---- test 1: small f32, weight-resident path -------------------------
    batch, seq, hidden, ffn = 2, 8, 32, 64
    kx, kw1, kb1, kw2, kb2, k2 = jax.random.split(key, 6)

    x = jax.random.normal(kx, (batch, seq, hidden), dtype=jnp.float32)
    w1 = jax.random.normal(kw1, (hidden, ffn), dtype=jnp.float32) * 0.05
    b1 = jax.random.normal(kb1, (ffn,), dtype=jnp.float32) * 0.05
    w2 = jax.random.normal(kw2, (ffn, hidden), dtype=jnp.float32) * 0.05
    b2 = jax.random.normal(kb2, (hidden,), dtype=jnp.float32) * 0.05

    out = jax.block_until_ready(feed_forward_network(x, w1, b1, w2, b2))
    y_ref = _ref_ffn(x, w1, b1, w2, b2)
    assert jnp.allclose(out, y_ref, atol=1e-5, rtol=1e-5), "f32 mismatch"

    # ---- test 2: bf16 operands (MXU bf16 path, f32 accumulation) ---------
    out_bf16 = jax.block_until_ready(feed_forward_network(
        x.astype(jnp.bfloat16),
        w1.astype(jnp.bfloat16), b1,
        w2.astype(jnp.bfloat16), b2))
    assert jnp.allclose(out_bf16.astype(jnp.float32), y_ref,
                        atol=5e-2, rtol=5e-2), "bf16 mismatch"

    # ---- test 3: streamed (accumulate-over-F) path, multiple F tiles -----
    hidden2, ffn2 = 128, 512
    kx2, kw1b, kb1b, kw2b, kb2b = jax.random.split(k2, 5)
    x2 = jax.random.normal(kx2, (batch, seq, hidden2), dtype=jnp.float32)
    w1b = jax.random.normal(kw1b, (hidden2, ffn2), dtype=jnp.float32) * 0.05
    b1b = jax.random.normal(kb1b, (ffn2,), dtype=jnp.float32) * 0.05
    w2b = jax.random.normal(kw2b, (ffn2, hidden2), dtype=jnp.float32) * 0.05
    b2b = jax.random.normal(kb2b, (hidden2,), dtype=jnp.float32) * 0.05

    out2 = jax.block_until_ready(feed_forward_network(
        x2, w1b, b1b, w2b, b2b, tile_f=256, _force_streamed=True))
    y_ref2 = _ref_ffn(x2, w1b, b1b, w2b, b2b)
    assert jnp.allclose(out2, y_ref2, atol=1e-4, rtol=1e-4), "streamed mismatch"

    print("KERNEL_OK")
</pallas_src>

<mosaic_0001>
module attributes {stable_mosaic.version = 11 : i64} {
  func.func @ffn_kernel_resident(%arg0: i32, %arg1: memref<16x32xf32, #tpu.memory_space<vmem>>, %arg2: memref<32x64xf32, #tpu.memory_space<vmem>>, %arg3: memref<1x64xf32, #tpu.memory_space<vmem>>, %arg4: memref<64x32xf32, #tpu.memory_space<vmem>>, %arg5: memref<1x32xf32, #tpu.memory_space<vmem>>, %arg6: memref<16x32xf32, #tpu.memory_space<vmem>>) attributes {dimension_semantics = [#tpu.dimension_semantics<parallel>], iteration_bounds = array<i64: 1>, scalar_prefetch = 0 : i64, scratch_operands = 0 : i64, tpu.core_type = #tpu.core_type<tc>, window_params = [{transform_indices = @transform_0, window_bounds = array<i64: 16, 32>}, {pipeline_mode = #tpu.pipeline_mode<synchronous>, transform_indices = @transform_1, window_bounds = array<i64: 32, 64>}, {pipeline_mode = #tpu.pipeline_mode<synchronous>, transform_indices = @transform_2, window_bounds = array<i64: 1, 64>}, {pipeline_mode = #tpu.pipeline_mode<synchronous>, transform_indices = @transform_3, window_bounds = array<i64: 64, 32>}, {pipeline_mode = #tpu.pipeline_mode<synchronous>, transform_indices = @transform_4, window_bounds = array<i64: 1, 32>}, {transform_indices = @transform_5, window_bounds = array<i64: 16, 32>}]} {
    %c0 = arith.constant 0 : index
    %c0_0 = arith.constant 0 : index
    %0 = vector.load %arg1[%c0, %c0_0] : memref<16x32xf32, #tpu.memory_space<vmem>>, vector<16x32xf32>
    %c0_1 = arith.constant 0 : index
    %c0_2 = arith.constant 0 : index
    %1 = vector.load %arg2[%c0_1, %c0_2] : memref<32x64xf32, #tpu.memory_space<vmem>>, vector<32x64xf32>
    %cst = arith.constant dense<0.000000e+00> : vector<16x64xf32>
    %2 = tpu.matmul %0, %1, %cst {dimension_numbers = #tpu.dot_dimension_numbers<[1], [0], [0], [1], [0, 0, 1, 1], [], []>} : vector<16x32xf32>, vector<32x64xf32>, vector<16x64xf32> -> vector<16x64xf32>
    %c0_3 = arith.constant 0 : index
    %c0_4 = arith.constant 0 : index
    %3 = vector.load %arg3[%c0_3, %c0_4] : memref<1x64xf32, #tpu.memory_space<vmem>>, vector<1x64xf32>
    %4 = vector.broadcast %3 : vector<1x64xf32> to vector<16x64xf32>
    %5 = arith.addf %2, %4 : vector<16x64xf32>
    %cst_5 = arith.constant 5.000000e-01 : f32
    %6 = vector.broadcast %cst_5 : f32 to vector<16x64xf32>
    %7 = arith.mulf %6, %5 : vector<16x64xf32>
    %cst_6 = arith.constant 0.707106769 : f32
    %8 = vector.broadcast %cst_6 : f32 to vector<16x64xf32>
    %9 = arith.mulf %5, %8 : vector<16x64xf32>
    %10 = math.erf %9 : vector<16x64xf32>
    %cst_7 = arith.constant 1.000000e+00 : f32
    %11 = vector.broadcast %cst_7 : f32 to vector<16x64xf32>
    %12 = arith.addf %11, %10 : vector<16x64xf32>
    %13 = arith.mulf %7, %12 : vector<16x64xf32>
    %c0_8 = arith.constant 0 : index
    %c0_9 = arith.constant 0 : index
    %14 = vector.load %arg4[%c0_8, %c0_9] : memref<64x32xf32, #tpu.memory_space<vmem>>, vector<64x32xf32>
    %cst_10 = arith.constant dense<0.000000e+00> : vector<16x32xf32>
    %15 = tpu.matmul %13, %14, %cst_10 {dimension_numbers = #tpu.dot_dimension_numbers<[1], [0], [0], [1], [0, 0, 1, 1], [], []>} : vector<16x64xf32>, vector<64x32xf32>, vector<16x32xf32> -> vector<16x32xf32>
    %c0_11 = arith.constant 0 : index
    %c0_12 = arith.constant 0 : index
    %16 = vector.load %arg5[%c0_11, %c0_12] : memref<1x32xf32, #tpu.memory_space<vmem>>, vector<1x32xf32>
    %17 = vector.broadcast %16 : vector<1x32xf32> to vector<16x32xf32>
    %18 = arith.addf %15, %17 : vector<16x32xf32>
    %c0_13 = arith.constant 0 : index
    %c0_14 = arith.constant 0 : index
    %19 = vector.load %arg6[%c0_13, %c0_14] : memref<16x32xf32, #tpu.memory_space<vmem>>, vector<16x32xf32>
    tpu.vector_store %arg6[%c0_13, %c0_14], %18 {strides = array<i32>} : memref<16x32xf32, #tpu.memory_space<vmem>>, vector<16x32xf32>,
    return
  }
  func.func @transform_0(%arg0: i32) -> (i32, i32) {
    %c0_i32 = arith.constant 0 : i32
    %c0_i32_0 = arith.constant 0 : i32
    return %arg0, %c0_i32 : i32, i32
  }
  func.func @transform_1(%arg0: i32) -> (i32, i32) {
    %c0_i32 = arith.constant 0 : i32
    %c0_i32_0 = arith.constant 0 : i32
    %c0_i32_1 = arith.constant 0 : i32
    return %c0_i32, %c0_i32_0 : i32, i32
  }
  func.func @transform_2(%arg0: i32) -> (i32, i32) {
    %c0_i32 = arith.constant 0 : i32
    %c0_i32_0 = arith.constant 0 : i32
    %c0_i32_1 = arith.constant 0 : i32
    return %c0_i32, %c0_i32_0 : i32, i32
  }
  func.func @transform_3(%arg0: i32) -> (i32, i32) {
    %c0_i32 = arith.constant 0 : i32
    %c0_i32_0 = arith.constant 0 : i32
    %c0_i32_1 = arith.constant 0 : i32
    return %c0_i32, %c0_i32_0 : i32, i32
  }
  func.func @transform_4(%arg0: i32) -> (i32, i32) {
    %c0_i32 = arith.constant 0 : i32
    %c0_i32_0 = arith.constant 0 : i32
    %c0_i32_1 = arith.constant 0 : i32
    return %c0_i32, %c0_i32_0 : i32, i32
  }
  func.func @transform_5(%arg0: i32) -> (i32, i32) {
    %c0_i32 = arith.constant 0 : i32
    %c0_i32_0 = arith.constant 0 : i32
    return %arg0, %c0_i32 : i32, i32
  }
}

</mosaic_0001>

<bundles_post_ra>
// kernel: tpu_custom_call.1
= control target key start
LH: loop header
LB: loop body
LE: loop exit
PB: predicated region body
PF: predicated region fallthrough
CT: control target
= control target key end

     0   :  { %vm34_vm0 = vcmask 261120   ;;  %s410_s0 = inlined_call_operand.vmem [shape: f32[16,32], index: 0, kind: input, shape index: {}]   ;;  %s411_s1 = inlined_call_operand.vmem [shape: f32[32,64], index: 1, kind: input, shape index: {}]   ;;  %s412_s2 = inlined_call_operand.vmem [shape: f32[1,64], index: 2, kind: input, shape index: {}]   ;;  %s413_s3 = inlined_call_operand.vmem [shape: f32[64,32], index: 3, kind: input, shape index: {}]   ;;  %s414_s4 = inlined_call_operand.vmem [shape: f32[1,32], index: 4, kind: input, shape index: {}]   ;;  %s415_s5 = inlined_call_operand.hbm [shape: f32[16,32], index: 5, kind: output, shape index: {}]  }
   0x1   :  { %v26_v0 = vld [vmem:[%s411_s1 + $0x18] sm:$0xff]  ;;  %v25_v1 = vld [vmem:[%s411_s1 + $0x10] sm:$0xff]  ;;  %v21_v2 = vld [vmem:[%s410_s0] sm:$0xff] }
   0x2   :  { %263 = vmatprep.subr.mxu0 %v26_v0  ;;  %v24_v3 = vld [vmem:[%s411_s1 + $0x8] sm:$0xff]  ;;  %271 = vmatprep.mubr.msk.f32.mxu0 %vm34_vm0, %v21_v2 }
   0x3   :  { %264 = vmatpush3.msra.mxu0 %v26_v0 }
   0x4   :  { %10 = vsyncpa [#allocation3], 0  ;;  %265 = vmatprep.subr.mxu0 %v25_v1  ;;  %v23_v4 = vld [vmem:[%s411_s1] sm:$0xff]  ;;  %v22_v5 = vld [vmem:[%s410_s0 + $0x8] sm:$0xff]  ;;  %vm141_vm1 = vcmask 523264   ;;  %s322_s21 = smov [#allocation2]  }
   0x5   :  { %266 = vmatpush3.msra.mxu0 %v25_v1  ;;  %v133_v6 = vld [vmem:[%s413_s3 + $0x38] sm:$0xff]  ;;  %v132_v7 = vld [vmem:[%s413_s3 + $0x30] sm:$0xff]  ;;  %v131_v8 = vld [vmem:[%s413_s3 + $0x28] sm:$0xff]  ;;  %s230_s22 = sshll.u32 %s322_s21, 4  ;;  %s231_s22 = int_to_ptr.vmem [resolvable:$true] %s230_s22 }
   0x6   :  { %267 = vmatprep.subr.mxu0 %v24_v3  ;;  %274 = vmatprep.subr.mxu1 %v133_v6  ;;  %v130_v9 = vld [vmem:[%s413_s3 + $0x20] sm:$0xff]  ;;  %v129_v10 = vld [vmem:[%s413_s3 + $0x18] sm:$0xff]  ;;  %v128_v11 = vld [vmem:[%s413_s3 + $0x10] sm:$0xff]  ;;  %s300_s23 = scalar_lea.vmem %s231_s22, 256  ;;  %p305_p1 = scmp.lt.s32.totalorder %s231_s22, %s231_s22 }
   0x7   :  { %268 = vmatpush3.msra.mxu0 %v24_v3  ;;  %275 = vmatpush3.msra.mxu1 %v133_v6  ;;  %v127_v12 = vld [vmem:[%s413_s3 + $0x8] sm:$0xff]  ;;  %v126_v13 = vld [vmem:[%s413_s3] sm:$0xff]  ;;  %p301_p0 = scmp.ne.s32.totalorder %s231_s22, %s300_s23  ;;  %p306_p2 = scmp.lt.s32.totalorder %s300_s23, %s300_s23 }
   0x8   :  { %269 = vmatprep.subr.mxu0 %v23_v4  ;;  %276 = vmatprep.subr.mxu1 %v132_v7  ;;  %v241_v14 = vld [vmem:[%s412_s2] ss:$0 sm:$0xff] }
   0x9   :  { %270 = vmatpush3.msra.mxu0 %v23_v4  ;;  %277 = vmatpush3.msra.mxu1 %v132_v7  ;;  %v244_v29 = vld [vmem:[%s414_s4] ss:$0 sm:$0xff]  ;;  %p307_p3 = por %p306_p2, %p305_p1 }
   0xa   :  { %272 = vmatmul.mubr.msk.f32.vlgmr.msra.gmra.mxu0 %vm34_vm0, %v22_v5  ;;  %278 = vmatprep.subr.mxu1 %v131_v8 }
   0xb   :  { %279 = vmatpush3.msra.mxu1 %v131_v8  ;;  %p308_p4 = pnand %p307_p3, %p301_p0 }
   0xc   :  { %280 = vmatprep.subr.mxu1 %v130_v9 }
   0xd   :  { %281 = vmatpush3.msra.mxu1 %v130_v9 }
   0xe   :  { %282 = vmatprep.subr.mxu1 %v129_v10 }
   0xf   :  { %283 = vmatpush3.msra.mxu1 %v129_v10 }
  0x10   :  { %284 = vmatprep.subr.mxu1 %v128_v11 }
  0x11   :  { %285 = vmatpush3.msra.mxu1 %v128_v11 }
  0x12   :  { %286 = vmatprep.subr.mxu1 %v127_v12 }
  0x13   :  { %287 = vmatpush3.msra.mxu1 %v127_v12 }
  0x14   :  { %288 = vmatprep.subr.mxu1 %v126_v13 }
  0x15   :  { %289 = vmatpush3.msra.mxu1 %v126_v13 }
  0xca   :  { %v273_v15 = vpop.f32.mrf.mxu0 }
  0xcb   :  { %v113_v16 = vadd.f32 %v273_v15, %v241_v14 }
  0xcc   :  { %v107_v17 = vpop.f32.mrf.mxu0 }
  0xcd   :  { %v119_v18 = vmul.f32 0.70710677, %v113_v16  ;;  %v108_v19 = vadd.f32 %v241_v14, %v107_v17  ;;  %v117_v26 = vmul.f32 0.5, %v113_v16 }
  0xcf   :  { %296 = verf.f32 %v119_v18  ;;  %v118_v20 = vmul.f32 0.70710677, %v108_v19  ;;  %v116_v24 = vmul.f32 0.5, %v108_v19 }
  0xd1   :  { %298 = verf.f32 %v118_v20 }
  0xdc   :  { %v297_v21 = vpop.eup %296 }
  0xdd   :  { %v123_v23 = vadd.f32 1.0, %v297_v21 }
  0xde   :  { %v299_v22 = vpop.eup %298 }
  0xdf   :  { %v122_v25 = vadd.f32 1.0, %v299_v22  ;;  %v125_v28 = vmul.f32 %v123_v23, %v117_v26 }
  0xe1   :  { %v124_v27 = vmul.f32 %v122_v25, %v116_v24 }
  0xe3   :  { %290 = vmatprep.mubr.msk.f32.mxu1 %vm141_vm1, %v124_v27 }
  0xe4   :  { %291 = vmatmul.mubr.msk.f32.vlgmr.msra.gmra.mxu1 %vm141_vm1, %v125_v28 }
 0x1a4   :  { %v292_v30 = vpop.f32.mrf.mxu1 }
 0x1a5   :  { %v220_v31 = vadd.f32 %v292_v30, %v244_v29 }
 0x1a6   :  { %v214_v32 = vpop.f32.mrf.mxu1 }
 0x1a7   :  { %224 = vst.msk [vmem:[#allocation2 + $0x8] sm:$0xff] %vm34_vm0, %v220_v31  ;;  %v215_v33 = vadd.f32 %v244_v29, %v214_v32 }
 0x1a9   :  { %223 = vst.msk [vmem:[#allocation2] sm:$0xff] %vm34_vm0, %v215_v33 }
 0x1aa   :  { %311 = shalt.err (!%p308_p4)
}
 0x1ab   :  { %s323_s24 = smov 128   ;;  %s324_s4 = smov 8  }
 0x1ac   :  { %236 = dma.vmem_to_hbm [thread:$0]  %s231_s22, 256, %s415_s5, [#allocation3], %s323_s24, %s323_s24, %s324_s4  }
 0x1ad   :  { %320 = dma.done.wait [#allocation3], 256  }
 0x1ae   :  { %321 = vsyncadd [#allocation3], 4294967040 }
 0x1af   :  { %240 = vsyncpa [#allocation3], 1 }

</bundles_post_ra>
